<compile_context>
chip_gen: v5e
topology: v5e:2x2
jax: 0.10.0
libtpu: 0.0.40
codegen_flags: <defaults>
</compile_context>

<pallas_src>
import math

import jax
import jax.numpy as jnp
from jax.experimental import pallas as pl
from jax.experimental.pallas import tpu as pltpu


def _build_pe_table(d_model: int, max_len: int = 200) -> jnp.ndarray:
    """Deterministic sinusoidal PE buffer, shape [max_len, d_model] (f32)."""
    position = jnp.arange(max_len, dtype=jnp.float32)[:, None]            # [L, 1]
    div_term = jnp.exp(
        jnp.arange(0, d_model, 2, dtype=jnp.float32)
        * (-math.log(10000.0) / d_model)
    )                                                                      # [D/2]
    pe = jnp.zeros((max_len, d_model), dtype=jnp.float32)
    pe = pe.at[:, 0::2].set(jnp.sin(position * div_term))
    pe = pe.at[:, 1::2].set(jnp.cos(position * div_term))
    return pe


def _pe_add_kernel(x_ref, pe_ref, o_ref):
    # x_ref : (TS, BDp) tile of the flattened (lane-padded) input
    # pe_ref: (1,  BDp) flattened pe row; jnp broadcasts it over the TS
    #         sublanes (hidden under the tile DMA on this mem-bound op).
    o_ref[...] = x_ref[...] + pe_ref[...]


def _choose_tile_rows(S, row_bytes, itemsize, target_tile_bytes, min_steps=8):
    """Rows per tile: dtype-packed, ~target_tile_bytes, >=min_steps grid steps."""
    packing = max(8, 32 // itemsize)          # 8 f32 / 16 bf16 / 32 int8-fp8
    rows = max(1, target_tile_bytes // row_bytes)
    if rows >= S:
        return S                              # full extent -> always legal
    # Keep >= min_steps grid steps when S allows: lets the "parallel" seq axis
    # shard across v7x's 2 TCs while each TC still double-buffers several tiles.
    if S >= packing * min_steps:
        rows = min(rows, max(packing, S // min_steps))
    rows = max(packing, (rows // packing) * packing)
    if rows >= S:
        return S
    # Prefer a divisor of S (no ragged / masked final tile), but never shrink
    # the tile by more than 2x for it.
    for cand in range(rows, max(packing, rows // 2) - 1, -packing):
        if S % cand == 0:
            return cand
    return rows


def positional_encoding_forward(
    x: jnp.ndarray,
    pe_table: jnp.ndarray,
    *,
    target_tile_bytes: int = 4 * 1024 * 1024,
    min_pallas_bytes: int = 1 * 1024 * 1024,
    vmem_limit_bytes: int = 48 * 1024 * 1024,
) -> jnp.ndarray:
    """x: [seq_len, batch, d_model] -> [seq_len, batch, d_model]."""
    S, B, D = x.shape

    # Faithful to the PyTorch code: pe is sliced by the BATCH size (x.size(0)
    # after the transpose) and broadcast over the seq axis.
    assert B <= pe_table.shape[0], "batch size exceeds positional-encoding max_len"
    pe_b = pe_table[:B].astype(x.dtype)                                    # [B, D]

    itemsize = jnp.dtype(x.dtype).itemsize
    total_bytes = S * B * D * itemsize
    if total_bytes < min_pallas_bytes:
        # Tiny problem: kernel-launch + pipeline-priming overhead dominates;
        # let XLA fuse the add into neighboring ops instead.
        return x + pe_b[None, :, :]

    BD = B * D
    BD_pad = ((BD + 127) // 128) * 128                                     # lane-dense
    x2d = x.reshape(S, BD)
    pe_row = pe_b.reshape(1, BD)
    if BD_pad != BD:
        x2d = jnp.pad(x2d, ((0, 0), (0, BD_pad - BD)))
        pe_row = jnp.pad(pe_row, ((0, 0), (0, BD_pad - BD)))

    ts = _choose_tile_rows(S, BD_pad * itemsize, itemsize, target_tile_bytes)
    grid = (pl.cdiv(S, ts),)

    cost = pl.CostEstimate(
        flops=S * BD_pad,
        transcendentals=0,
        bytes_accessed=2 * S * BD_pad * itemsize + BD_pad * itemsize,
    )

    out2d = pl.pallas_call(
        _pe_add_kernel,
        out_shape=jax.ShapeDtypeStruct((S, BD_pad), x.dtype),
        grid_spec=pltpu.PrefetchScalarGridSpec(
            num_scalar_prefetch=0,
            grid=grid,
            in_specs=[
                pl.BlockSpec((ts, BD_pad), lambda i: (i, 0)),   # x tile (lane-dense)
                pl.BlockSpec((1, BD_pad), lambda i: (0, 0)),    # pe row, VMEM-resident
            ],
            out_specs=pl.BlockSpec((ts, BD_pad), lambda i: (i, 0)),
        ),
        compiler_params=pltpu.CompilerParams(
            dimension_semantics=("parallel",),     # shards seq across TCs on v7x
            vmem_limit_bytes=vmem_limit_bytes,     # clears v5e's 16 MiB scoped default
        ),
        cost_estimate=cost,
        input_output_aliases={0: 0},               # reuse x's HBM buffer
    )(x2d, pe_row)

    if BD_pad != BD:
        out2d = out2d[:, :BD]
    return out2d.reshape(S, B, D)


if __name__ == "__main__":
    key = jax.random.PRNGKey(0)

    # Small shape; B*D = 96 is NOT a multiple of 128, so the lane-padding
    # path (pad to 128, slice back) is exercised too.
    seq_len, batch, d_model = 64, 2, 48
    x = jax.random.normal(key, (seq_len, batch, d_model), dtype=jnp.float32)
    pe_table = _build_pe_table(d_model, max_len=200)

    # Pure-JAX reference of the exact PyTorch semantics (eval mode).
    xt = jnp.transpose(x, (1, 0, 2))                       # [B, S, D]
    ref = xt + pe_table[:batch][:, None, :]                # pe[:x.size(0)] -> [B,1,D]
    ref = jnp.transpose(ref, (1, 0, 2))                    # back to [S, B, D]

    # 1) Default tiling (whole seq fits one tile). min_pallas_bytes=0 forces
    #    the Pallas path even though this demo problem is tiny.
    fwd = jax.jit(lambda a, p: positional_encoding_forward(a, p, min_pallas_bytes=0))
    out = jax.block_until_ready(fwd(x, pe_table))
    assert out.shape == x.shape and out.dtype == x.dtype
    assert jnp.allclose(out, ref, atol=1e-6, rtol=1e-6)

    # 2) Tiny target tile -> multi-step grid (exercises the pipelined path).
    fwd_tiled = jax.jit(lambda a, p: positional_encoding_forward(
        a, p, target_tile_bytes=4096, min_pallas_bytes=0))
    out2 = jax.block_until_ready(fwd_tiled(x, pe_table))
    assert jnp.allclose(out2, ref, atol=1e-6, rtol=1e-6)

    print("KERNEL_OK")
</pallas_src>

<mosaic_0001>
module attributes {stable_mosaic.version = 11 : i64} {
  func.func @_pe_add_kernel(%arg0: i32, %arg1: memref<64x128xf32, #tpu.memory_space<vmem>>, %arg2: memref<1x128xf32, #tpu.memory_space<vmem>>, %arg3: memref<64x128xf32, #tpu.memory_space<vmem>>) attributes {dimension_semantics = [#tpu.dimension_semantics<parallel>], iteration_bounds = array<i64: 1>, scalar_prefetch = 0 : i64, scratch_operands = 0 : i64, tpu.core_type = #tpu.core_type<tc>, window_params = [{transform_indices = @transform_0, window_bounds = array<i64: 64, 128>}, {pipeline_mode = #tpu.pipeline_mode<synchronous>, transform_indices = @transform_1, window_bounds = array<i64: 1, 128>}, {transform_indices = @transform_2, window_bounds = array<i64: 64, 128>}]} {
    %c0 = arith.constant 0 : index
    %c0_0 = arith.constant 0 : index
    %0 = vector.load %arg1[%c0, %c0_0] : memref<64x128xf32, #tpu.memory_space<vmem>>, vector<64x128xf32>
    %c0_1 = arith.constant 0 : index
    %c0_2 = arith.constant 0 : index
    %1 = vector.load %arg2[%c0_1, %c0_2] : memref<1x128xf32, #tpu.memory_space<vmem>>, vector<1x128xf32>
    %2 = vector.broadcast %1 : vector<1x128xf32> to vector<64x128xf32>
    %3 = arith.addf %0, %2 : vector<64x128xf32>
    %c0_3 = arith.constant 0 : index
    %c0_4 = arith.constant 0 : index
    %4 = vector.load %arg3[%c0_3, %c0_4] : memref<64x128xf32, #tpu.memory_space<vmem>>, vector<64x128xf32>
    tpu.vector_store %arg3[%c0_3, %c0_4], %3 {strides = array<i32>} : memref<64x128xf32, #tpu.memory_space<vmem>>, vector<64x128xf32>,
    return
  }
  func.func @transform_0(%arg0: i32) -> (i32, i32) {
    %c0_i32 = arith.constant 0 : i32
    %c0_i32_0 = arith.constant 0 : i32
    return %arg0, %c0_i32 : i32, i32
  }
  func.func @transform_1(%arg0: i32) -> (i32, i32) {
    %c0_i32 = arith.constant 0 : i32
    %c0_i32_0 = arith.constant 0 : i32
    %c0_i32_1 = arith.constant 0 : i32
    return %c0_i32, %c0_i32_0 : i32, i32
  }
  func.func @transform_2(%arg0: i32) -> (i32, i32) {
    %c0_i32 = arith.constant 0 : i32
    %c0_i32_0 = arith.constant 0 : i32
    return %arg0, %c0_i32 : i32, i32
  }
}

</mosaic_0001>

<bundles_post_ra>
// kernel: _lambda_.1
= control target key start
LH: loop header
LB: loop body
LE: loop exit
PB: predicated region body
PF: predicated region fallthrough
CT: control target
= control target key end

     0   :  { %s110_s0 = inlined_call_operand.vmem [shape: f32[64,128], index: 0, kind: input, shape index: {}, may-alias: {0,2}]   ;;  %s111_s1 = inlined_call_operand.vmem [shape: f32[1,128], index: 1, kind: input, shape index: {}]   ;;  %s112_s2 = inlined_call_operand.vmem [shape: f32[64,128], index: 2, kind: output, shape index: {}, may-alias: {0,2}]  }
   0x1   :  { %v11_v0 = vld [vmem:[%s110_s0] sm:$0xff]  ;;  %v12_v2 = vld [vmem:[%s110_s0 + $0x8] sm:$0xff]  ;;  %v13_v3 = vld [vmem:[%s110_s0 + $0x10] sm:$0xff] }
   0x2   :  { %v43_v1 = vld [vmem:[%s111_s1] ss:$0 sm:$0xff]  ;;  %v14_v4 = vld [vmem:[%s110_s0 + $0x18] sm:$0xff]  ;;  %v16_v9 = vld [vmem:[%s110_s0 + $0x28] sm:$0xff] }
   0x3   :  { %v23_v5 = vadd.f32 %v43_v1, %v11_v0  ;;  %v24_v6 = vadd.f32 %v43_v1, %v12_v2  ;;  %v25_v7 = vadd.f32 %v43_v1, %v13_v3  ;;  %v15_v8 = vld [vmem:[%s110_s0 + $0x20] sm:$0xff]  ;;  %v26_v10 = vadd.f32 %v43_v1, %v14_v4  ;;  %v17_v11 = vld [vmem:[%s110_s0 + $0x30] sm:$0xff] }
   0x4   :  { %v27_v12 = vadd.f32 %v43_v1, %v15_v8  ;;  %v28_v14 = vadd.f32 %v43_v1, %v16_v9  ;;  %v29_v15 = vadd.f32 %v43_v1, %v17_v11 }
   0x5   :  { %31 = vst [vmem:[%s112_s2] sm:$0xff] %v23_v5 }
   0xc   :  { %v18_v13 = vld [vmem:[%s110_s0 + $0x38] sm:$0xff] }
   0xd   :  { %32 = vst [vmem:[%s112_s2 + $0x8] sm:$0xff] %v24_v6  ;;  %v30_v16 = vadd.f32 %v43_v1, %v18_v13 }
   0xe   :  { %33 = vst [vmem:[%s112_s2 + $0x10] sm:$0xff] %v25_v7 }
   0xf   :  { %34 = vst [vmem:[%s112_s2 + $0x18] sm:$0xff] %v26_v10 }
  0x10   :  { %35 = vst [vmem:[%s112_s2 + $0x20] sm:$0xff] %v27_v12 }
  0x11   :  { %36 = vst [vmem:[%s112_s2 + $0x28] sm:$0xff] %v28_v14 }
  0x12   :  { %37 = vst [vmem:[%s112_s2 + $0x30] sm:$0xff] %v29_v15 }
  0x13   :  { %38 = vst [vmem:[%s112_s2 + $0x38] sm:$0xff] %v30_v16 }

</bundles_post_ra>
